<compile_context>
chip_gen: v7x
topology: tpu7x:2x2x1
jax: 0.10.0
libtpu: 0.0.40
codegen_flags: <defaults>
</compile_context>

<pallas_src>
import jax
import jax.numpy as jnp
from jax import lax
from jax.experimental import pallas as pl
from jax.experimental.pallas import tpu as pltpu


def _choose_tile_b(B, S, itemsize=4):
    """Pick a batch-tile size: multiple of 8 sublanes, ~2 MiB per input tile."""
    target_bytes = 2 << 20
    tb = target_bytes // max(1, S * itemsize)
    tb = max(8, min(512, (tb // 8) * 8))
    if B <= tb:
        return B          # single tile covering the whole batch (always legal)
    return tb


def _make_kernel(B, TB):
    def kernel(pred_ref, label_ref, invlen_ref, out_ref):
        i = pl.program_id(0)

        pred = pred_ref[...].astype(jnp.float32)      # (TB, S)
        label = label_ref[...].astype(jnp.float32)    # (TB, S)
        inv_len = invlen_ref[...]                     # (TB, 1) f32

        # Ignore label == -1 entries.  Select (not multiply) so NaN/garbage in
        # masked or out-of-bounds positions cannot leak into the sum.
        contrib = jnp.where(label != -1.0, jnp.abs(pred - label), 0.0)
        loss_per_sent = jnp.sum(contrib, axis=1, keepdims=True)     # (TB, 1)

        # Mask rows past the true batch size on the ragged last tile.
        row = i * TB + lax.broadcasted_iota(jnp.int32, (TB, 1), 0)
        weighted = jnp.where(row < B, loss_per_sent * inv_len, 0.0)

        partial = jnp.sum(weighted)                   # per-tile scalar partial
        # Lane-dense output block; wrapper reads lane [0, 0] of each tile.
        out_ref[...] = jnp.broadcast_to(partial, (1, 8, 128))

    return kernel


def l1_depth_loss(predictions, label_batch, length_batch, *, tile_b=None):
    """Returns (batch_loss, total_sents) as 0-d float32 arrays."""
    B, S = predictions.shape

    # O(B) scalar work stays in plain JAX, outside the hot streaming loop.
    length_f = length_batch.astype(jnp.float32).reshape(B)
    total_sents = jnp.sum((length_f != 0.0).astype(jnp.float32))
    # Faithful to the reference: no zero-length guard (0-length -> inf/NaN).
    inv_len = (1.0 / length_f).reshape(B, 1)

    if tile_b is None:
        TB = _choose_tile_b(B, S)
    else:
        TB = B if B <= tile_b else tile_b
    if B > TB and TB % 8 != 0:
        raise ValueError("tile_b must be a multiple of 8 when it tiles the batch")
    num_tiles = pl.cdiv(B, TB)

    partials = pl.pallas_call(
        _make_kernel(B, TB),
        out_shape=jax.ShapeDtypeStruct((num_tiles, 8, 128), jnp.float32),
        grid=(num_tiles,),
        in_specs=[
            pl.BlockSpec((TB, S), lambda i: (i, 0)),   # predictions (native dtype)
            pl.BlockSpec((TB, S), lambda i: (i, 0)),   # labels      (native dtype)
            pl.BlockSpec((TB, 1), lambda i: (i, 0)),   # 1/length column
        ],
        out_specs=pl.BlockSpec((1, 8, 128), lambda i: (i, 0, 0)),
        compiler_params=pltpu.CompilerParams(
            dimension_semantics=("parallel",)),
    )(predictions, label_batch, inv_len)

    loss_sum = jnp.sum(partials[:, 0, 0])
    batch_loss = jnp.where(total_sents > 0.0,
                           loss_sum / total_sents,
                           jnp.zeros((), jnp.float32))
    return batch_loss, total_sents


def _reference(predictions, label_batch, length_batch):
    total_sents = jnp.sum(length_batch != 0).astype(jnp.float32)
    labels_1s = (label_batch != -1).astype(jnp.float32)
    pm = predictions * labels_1s
    lm = label_batch * labels_1s
    lps = jnp.sum(jnp.abs(pm - lm), axis=1)
    norm = lps / length_batch.astype(jnp.float32)
    loss = jnp.where(total_sents > 0, jnp.sum(norm) / total_sents, 0.0)
    return loss, total_sents


if __name__ == "__main__":
    key = jax.random.PRNGKey(0)
    k1, k2 = jax.random.split(key)

    B, S = 20, 16  # small, but B > tile_b below so the multi-tile/ragged path runs

    predictions = jax.random.normal(k1, (B, S), dtype=jnp.float32)

    # true depths; pad positions marked with -1; all lengths non-zero
    lengths = (jnp.arange(B, dtype=jnp.int32) % S) + 1
    word_idx = jnp.arange(S, dtype=jnp.int32)[None, :]
    valid = word_idx < lengths[:, None]
    depths = jax.random.randint(k2, (B, S), 0, 6).astype(jnp.float32)
    label_batch = jnp.where(valid, depths, -1.0)

    # tile_b=8 -> grid of 3 batch tiles with a ragged (4-row) last tile
    batch_loss, total_sents = l1_depth_loss(predictions, label_batch, lengths,
                                            tile_b=8)
    jax.block_until_ready((batch_loss, total_sents))

    ref_loss, ref_sents = _reference(predictions, label_batch, lengths)
    assert jnp.allclose(batch_loss, ref_loss, rtol=1e-5, atol=1e-5), (batch_loss, ref_loss)
    assert jnp.allclose(total_sents, ref_sents), (total_sents, ref_sents)

    print("KERNEL_OK")
</pallas_src>

<mosaic_0001>
module attributes {stable_mosaic.version = 11 : i64} {
  func.func @kernel(%arg0: i32, %arg1: memref<8x16xf32, #tpu.memory_space<vmem>>, %arg2: memref<8x16xf32, #tpu.memory_space<vmem>>, %arg3: memref<8x1xf32, #tpu.memory_space<vmem>>, %arg4: memref<1x8x128xf32, #tpu.memory_space<vmem>>) attributes {dimension_semantics = [#tpu.dimension_semantics<parallel>], iteration_bounds = array<i64: 3>, scalar_prefetch = 0 : i64, scratch_operands = 0 : i64, tpu.core_type = #tpu.core_type<tc>, window_params = [{transform_indices = @transform_0, window_bounds = array<i64: 8, 16>}, {transform_indices = @transform_1, window_bounds = array<i64: 8, 16>}, {transform_indices = @transform_2, window_bounds = array<i64: 8, 1>}, {transform_indices = @transform_3, window_bounds = array<i64: 1, 8, 128>}]} {
    %c0 = arith.constant 0 : index
    %c0_0 = arith.constant 0 : index
    %0 = vector.load %arg1[%c0, %c0_0] : memref<8x16xf32, #tpu.memory_space<vmem>>, vector<8x16xf32>
    %c0_1 = arith.constant 0 : index
    %c0_2 = arith.constant 0 : index
    %1 = vector.load %arg2[%c0_1, %c0_2] : memref<8x16xf32, #tpu.memory_space<vmem>>, vector<8x16xf32>
    %c0_3 = arith.constant 0 : index
    %c0_4 = arith.constant 0 : index
    %2 = vector.load %arg3[%c0_3, %c0_4] : memref<8x1xf32, #tpu.memory_space<vmem>>, vector<8x1xf32>
    %cst = arith.constant -1.000000e+00 : f32
    %3 = vector.broadcast %cst : f32 to vector<8x16xf32>
    %4 = arith.cmpf one, %1, %3 : vector<8x16xf32>
    %5 = arith.subf %0, %1 : vector<8x16xf32>
    %6 = math.absf %5 : vector<8x16xf32>
    %cst_5 = arith.constant 0.000000e+00 : f32
    %7 = vector.broadcast %cst_5 : f32 to vector<8x16xf32>
    %8 = arith.select %4, %6, %7 : vector<8x16xi1>, vector<8x16xf32>
    %cst_6 = arith.constant dense<0.000000e+00> : vector<8xf32>
    %9 = vector.multi_reduction <add>, %8, %cst_6 [1] : vector<8x16xf32> to vector<8xf32>
    %10 = vector.shape_cast %9 : vector<8xf32> to vector<8x1xf32>
    %c8_i32 = arith.constant 8 : i32
    %11 = arith.muli %arg0, %c8_i32 : i32
    %12 = tpu.iota {dimensions = array<i32: 0>} : vector<8x1xi32>
    %13 = vector.broadcast %11 : i32 to vector<8x1xi32>
    %14 = arith.addi %13, %12 : vector<8x1xi32>
    %c20_i32 = arith.constant 20 : i32
    %15 = vector.broadcast %c20_i32 : i32 to vector<8x1xi32>
    %16 = arith.cmpi slt, %14, %15 : vector<8x1xi32>
    %17 = arith.mulf %10, %2 : vector<8x1xf32>
    %cst_7 = arith.constant 0.000000e+00 : f32
    %18 = vector.broadcast %cst_7 : f32 to vector<8x1xf32>
    %19 = arith.select %16, %17, %18 : vector<8x1xi1>, vector<8x1xf32>
    %20 = vector.shape_cast %19 : vector<8x1xf32> to vector<1x8x1xf32>
    %cst_8 = arith.constant dense<0.000000e+00> : vector<1xf32>
    %21 = vector.multi_reduction <add>, %20, %cst_8 [1, 2] : vector<1x8x1xf32> to vector<1xf32>
    %22 = vector.shape_cast %21 : vector<1xf32> to vector<1x1x1xf32>
    %23 = vector.extract %22[0, 0, 0] : f32 from vector<1x1x1xf32>
    %24 = vector.broadcast %23 : f32 to vector<1x8x128xf32>
    %c0_9 = arith.constant 0 : index
    %c0_10 = arith.constant 0 : index
    %c0_11 = arith.constant 0 : index
    %25 = vector.load %arg4[%c0_9, %c0_10, %c0_11] : memref<1x8x128xf32, #tpu.memory_space<vmem>>, vector<1x8x128xf32>
    tpu.vector_store %arg4[%c0_9, %c0_10, %c0_11], %24 {strides = array<i32>} : memref<1x8x128xf32, #tpu.memory_space<vmem>>, vector<1x8x128xf32>,
    return
  }
  func.func @transform_0(%arg0: i32) -> (i32, i32) {
    %c0_i32 = arith.constant 0 : i32
    %c0_i32_0 = arith.constant 0 : i32
    return %arg0, %c0_i32 : i32, i32
  }
  func.func @transform_1(%arg0: i32) -> (i32, i32) {
    %c0_i32 = arith.constant 0 : i32
    %c0_i32_0 = arith.constant 0 : i32
    return %arg0, %c0_i32 : i32, i32
  }
  func.func @transform_2(%arg0: i32) -> (i32, i32) {
    %c0_i32 = arith.constant 0 : i32
    %c0_i32_0 = arith.constant 0 : i32
    return %arg0, %c0_i32 : i32, i32
  }
  func.func @transform_3(%arg0: i32) -> (i32, i32, i32) {
    %c0_i32 = arith.constant 0 : i32
    %c0_i32_0 = arith.constant 0 : i32
    %c0_i32_1 = arith.constant 0 : i32
    return %arg0, %c0_i32, %c0_i32_0 : i32, i32, i32
  }
}

</mosaic_0001>

<bundles_post_ra>
// kernel: tpu_custom_call.1
= control target key start
LH: loop header
LB: loop body
LE: loop exit
PB: predicated region body
PF: predicated region fallthrough
CT: control target
= control target key end

     0   :  { %8 = vsyncpa [#allocation3], 0  ;;  %s575_s0 = inlined_call_operand.vmem [shape: f32[20,16], index: 0, kind: input, shape index: {}]   ;;  %s576_s1 = inlined_call_operand.vmem [shape: f32[20,16], index: 1, kind: input, shape index: {}]   ;;  %s577_s2 = inlined_call_operand.vmem [shape: f32[20,1], index: 2, kind: input, shape index: {}]   ;;  %s578_s3 = inlined_call_operand.hbm [shape: f32[3,8,128], index: 3, kind: output, shape index: {}]  }
   0x1   :  { %10 = vsyncpa [#allocation3 + $0x1], 0  ;;  %s468_s12 = smov 0   ;;  %s470_s13 = smov 0  }
   0x2   :  { %s472_s14 = smov 0   ;;  %s474_s15 = smov 0  }
   0x3 LB: > { %s489_s16 = sadd.s32 4294967295, %s445_s15   ;;  %s329_s17 = sadd.s32 4294967294, %s445_s15   ;;  %s445_s15 = sphi %s474_s15, %s584_s15   ;;  %s441_s14 = sphi %s472_s14, %s583_s14   ;;  %s437_s13 = sphi %s470_s13, %s582_s13   ;;  %s433_s12 = sphi %s468_s12, %s581_s12  }
   0x4   : > { %s493_s18 = sadd.s32 1, %s445_s15   ;;  %s101_s19 = sadd.s32 1, %s441_s14 }
   0x5   : > { %s98_s20 = ssub.s32 %s445_s15, %s493_s18  ;;  %p111_p0 = scmp.ne.s32.totalorder %s441_s14, %s437_s13 }
   0x6   : > { %p99_p1 = scmp.eq.s32.totalorder %s98_s20, 0  ;;  %p112_p2 = scmp.eq.s32.totalorder %s489_s16, 2 }
   0x7   : > { %p117_p3 = scmp.ne.s32.totalorder %s437_s13, %s433_s12  ;;  %p118_p4 = scmp.eq.s32.totalorder %s329_s17, 2 }
   0x8   : > { %s504_s21 = scalar_select %p99_p1, %s441_s14, %s101_s19  }
   0x9   : > { %p506_p5 = por %p112_p2, %p111_p0  ;;  %p510_p6 = por %p118_p4, %p117_p3 }
   0xa   : > { %p332_p7 = scmp.ge.s32.totalorder %s445_s15, 1  ;;  %p157_p8 = scmp.lt.s32.totalorder %s445_s15, 4 }
   0xc   : > { %p158_p9 = pnand %p332_p7, %p157_p8 }
   0xd   : > { %p188_p10 = scmp.lt.s32.totalorder (!%p158_p9), %s489_s16, 2  ;;  %vm207_vm1 = vcmask (!%p158_p9), 130048   ;;  %v212_v6 = vlaneseq (!%p158_p9)  ;;  %s337_s5 = sshll.u32 (!%p158_p9), %s489_s16, 3  ;;  %vm219_vm3 = vcmask (!%p158_p9), 7168  }
   0xe   : > { %161 = sbr.rel (%p158_p9) target bundleno = 398 (0x18e), region = 32  ;;  %v214_v8 = vstv (!%p158_p9), %s337_s5  ;;  %s185_s9 = sand.u32 (!%p158_p9), 1, %s437_s13  }
   0xf   : > { %v213_v7 = vshrl.u32 (!%p158_p9), %v212_v6, 7  ;;  %s333_s10 = sshll.u32 (!%p158_p9), %s185_s9, 3  ;;  %s339_s19 = sshll.u32 (!%p158_p9), %s489_s16, 7 }
  0x10   : > { %s187_s11 = scalar_lea.vmem (!%p158_p9), [#allocation2], %s333_s10  ;;  %s535_s26 = scalar_lea.hbm (!%p158_p9), %s578_s3, %s339_s19 }
  0x11   : > { %v215_v9 = vadd.s32 (!%p158_p9), %v214_v8, %v213_v7  ;;  %s246_s17 = sshll.u32 (!%p158_p9), %s187_s11, 4  ;;  %s233_s27 = scalar_lea.sflag (!%p158_p9), [#allocation3], %s185_s9  ;;  %s530_s17 = int_to_ptr.vmem [resolvable:$true] %s246_s17 }
  0x13   : > { %vm216_vm2 = vcmp.lt.s32.totalorder (!%p158_p9), %v215_v9, 20 }
  0x15   : > { %s189_s24 = scalar_select %p188_p10, %s489_s16, 2 }
  0x16   : > { %s447_s16 = smov [#allocation2]  }
  0x17   : > { %s334_s25 = sshll.u32 %s189_s24, 3  ;;  %s387_s29 = sshll.u32 %s447_s16, 4  ;;  %s388_s29 = int_to_ptr.vmem [resolvable:$false] %s387_s29 }
  0x18   : > { %s191_s28 = scalar_lea.vmem %s575_s0, %s334_s25  ;;  %s195_s4 = scalar_lea.vmem %s576_s1, %s334_s25 }
  0x19   : > { %v200_v0 = vld [vmem:[%s191_s28] sm:$0xff]  ;;  %s199_s8 = scalar_lea.vmem %s577_s2, %s334_s25  ;;  %s383_s28 = scalar_lea.vmem %s530_s17, 128 }
  0x1a   : > { %v201_v1 = vld [vmem:[%s195_s4] sm:$0xff]  ;;  %p384_p11 = scmp.ne.s32.totalorder %s530_s17, %s383_s28  ;;  %s389_s30 = scalar_lea.vmem %s388_s29, 256 }
  0x1b   : > { %v204_v2 = vsub.f32 %v200_v0, %v201_v1  ;;  %vm203_vm0 = vcmp.ne.f32.partialorder %v201_v1, -1.0  ;;  %v202_v10 = vld [vmem:[%s199_s8] sm:$0xff]  ;;  %p390_p0 = scmp.lt.s32.totalorder %s530_s17, %s388_s29  ;;  %p391_p1 = scmp.lt.s32.totalorder %s389_s30, %s383_s28 }
  0x1c   : > { %p385_p12 = pnand %p384_p11, %p506_p5 }
  0x1d   : > { %v205_v3 = vand.u32 2147483647, %v204_v2  ;;  %p392_p2 = por %p391_p1, %p390_p0 }
  0x1e   : > { %p386_p13 = pneg %p385_p12 }
  0x1f   : > { %v206_v4 = vsel %vm203_vm0, %v205_v3, 0.0 }
  0x20   : > { %v208_v5 = vsel %vm207_vm1, %v206_v4, 0.0  ;;  %p393_p3 = pnand %p392_p2, %p386_p13 }
  0x21   : > { %209 = vadd.xlane.f32.xlu0 %v208_v5 }
  0xae   : > { %v210_v11 = vpop.xlane.xlu0 %209 }
  0xaf   : > { %v217_v12 = vmul.f32 %v210_v11, %v202_v10 }
  0xb1   : > { %v218_v13 = vsel %vm216_vm2, %v217_v12, 0.0 }
  0xb2   : > { %v220_v14 = vsel %vm219_vm3, %v218_v13, 0.0 }
  0xb3   : > { %221 = vadd.xlane.f32.xlu0 %v220_v14 }
 0x140   : > { %v222_v15 = vpop.xlane.xlu0 %221 }
 0x141   : > { %v223_v16 = vrot.slane %v222_v15, 4 }
 0x143   : > { %v224_v17 = vadd.f32 %v223_v16, %v222_v15 }
 0x145   : > { %v225_v18 = vrot.slane %v224_v17, 2 }
 0x147   : > { %v226_v19 = vadd.f32 %v225_v18, %v224_v17 }
 0x149   : > { %v227_v20 = vrot.slane %v226_v19, 1 }
 0x14b   : > { %v228_v21 = vadd.f32 %v227_v20, %v226_v19 }
 0x14d   : > { %342 = vpush %v228_v21 }
 0x17e   : > { %s343_s20 = spop %342 }
 0x17f   : > { %v230_v22 = vstv %s343_s20 }
 0x180   : > { %231 = vst [vmem:[%s187_s11] sm:$0xff] %v230_v22 }
 0x181   : > { %396 = shalt.err (!%p393_p3)
}
 0x182   : > { %s397_s4 = scalar_lea.hbm %s535_s26, 128  ;;  %s401_s7 = scalar_lea.hbm %s578_s3, 384 }
 0x183   : > { %p398_p4 = scmp.ne.s32.totalorder %s535_s26, %s397_s4  ;;  %p402_p9 = scmp.lt.u32.totalorder %s535_s26, %s578_s3 }
 0x184   : > { %p403_p10 = scmp.lt.u32.totalorder %s401_s7, %s397_s4  ;;  %p405_p12 = scmp.lt.u32.totalorder %s397_s4, %s535_s26 }
 0x185   : > { %p399_p7 = pnand %p398_p4, %p506_p5 }
 0x186   : > { %p404_p11 = por %p403_p10, %p402_p9 }
 0x187   : > { %p400_p8 = pneg %p399_p7 }
 0x188   : > { %p406_p13 = por %p405_p12, %p404_p11 }
 0x18a   : > { %p407_p0 = pnand %p406_p13, %p400_p8 }
 0x18c   : > { %410 = shalt.err (!%p407_p0)
}
 0x18d   : > { %344 = dma.vmem_to_hbm [thread:$0]  (%p506_p5), %s530_s17, 128, %s535_s26, %s233_s27  }
 0x18e PF: > { %p350_p1 = scmp.ge.s32.totalorder %s445_s15, 2  ;;  %s258_s10 = sand.u32 1, %s433_s12  }
 0x18f   : > { %s259_s11 = scalar_lea.sflag [#allocation3], %s258_s10 }
 0x190   : > { %p347_p2 = pnand %p350_p1, %p510_p6 }
 0x192   : > { %428 = dma.done.wait (!%p347_p2), %s259_s11, 128  }
 0x193   : > { %430 = vsyncadd (!%p347_p2), %s259_s11, 4294967168  ;;  %p13_p3 = scmp.ge.s32.totalorder %s493_s18, 5   ;;  %s581_s12 = smov %s437_s13 }
 0x194   : > { %s582_s13 = smov %s441_s14  ;;  %s583_s14 = smov %s504_s21 }
 0x195   : > { %s584_s15 = smov %s493_s18  ;;  %15 = sbr.rel (!%p13_p3) target bundleno = 3 (0x3), region = 73 }
 0x19c   :  { %264 = vsyncpa [#allocation3], 1 }
 0x19d   :  { %266 = vsyncpa [#allocation3 + $0x1], 1 }

</bundles_post_ra>
